<compile_context>
chip_gen: v7x
topology: tpu7x:2x2x1
jax: 0.10.0
libtpu: 0.0.40
codegen_flags: <defaults>
</compile_context>

<pallas_src>
import jax
import jax.numpy as jnp
from jax.experimental import pallas as pl
from jax.experimental.pallas import tpu as pltpu


# ----------------------- settings (synthetic, deterministic) -----------------
NUM_CLAUSES = 8          # number of clause nodes
CLABEL_DIM = 4           # clause feature / label dim   (cp_add_labels)
GSS_DIM = 8              # settings['state_dim']        (cp_add_gss)
EMB_DIM = 16             # encoder.output_size()        (cp_add_embedding)
NUM_CATEGORIES = 2       # settings['cp_num_categories']
INP_SIZE = EMB_DIM + CLABEL_DIM + GSS_DIM   # 28
H1, H2 = 256, 64


def _round_up(x, m):
    return ((x + m - 1) // m) * m


# ------------------------------- kernel --------------------------------------
def _clause_prediction_kernel(
    cf_ref,                  # [TN, CLABEL_DIM]  f32 clause features
    gss_ref,                 # [TN, GSS_DIM]     f32 global solver state
    we_ref, be_ref,          # [CLABEL, EMB] bf16, [1, EMB] f32
    w1e_ref, w1c_ref, w1g_ref,   # [EMB,H1], [CLABEL,H1], [GSS,H1]  bf16 (pre-split w1)
    b1_ref,                  # [1, H1] f32
    w2_ref, b2_ref,          # [H1, H2] bf16, [1, H2] f32
    w3_ref, b3_ref,          # [H2, C]  bf16, [1, C]  f32
    out_ref,                 # [TN, C]  f32
):
    bf16 = jnp.bfloat16
    cf = cf_ref[...].astype(bf16)
    g = gss_ref[...].astype(bf16)

    # Encoder stand-in: cembs = relu(clause_feats @ We + be), f32 accumulate.
    cembs = jnp.maximum(
        jnp.dot(cf, we_ref[...], preferred_element_type=jnp.float32) + be_ref[...],
        0.0,
    ).astype(bf16)

    # h1 = relu([cembs, clause_feats, gss] @ w1 + b1), concat-free via split w1.
    h1 = jnp.maximum(
        jnp.dot(cembs, w1e_ref[...], preferred_element_type=jnp.float32)
        + jnp.dot(cf, w1c_ref[...], preferred_element_type=jnp.float32)
        + jnp.dot(g, w1g_ref[...], preferred_element_type=jnp.float32)
        + b1_ref[...],
        0.0,
    ).astype(bf16)

    h2 = jnp.maximum(
        jnp.dot(h1, w2_ref[...], preferred_element_type=jnp.float32) + b2_ref[...],
        0.0,
    ).astype(bf16)

    logits = (
        jnp.dot(h2, w3_ref[...], preferred_element_type=jnp.float32) + b3_ref[...]
    )
    out_ref[...] = logits.astype(out_ref.dtype)


# ------------------------------- wrapper --------------------------------------
def prepare_params(params):
    """One-time host-side transform of module params into kernel layout (bf16 weights)."""
    bf16, f32 = jnp.bfloat16, jnp.float32
    w1 = params["w1"].astype(f32)                     # [INP, H1]
    return dict(
        we=params["we"].astype(bf16),                 # [CLABEL, EMB]
        be=params["be"].astype(f32),                  # [1, EMB]
        w1e=w1[:EMB_DIM].astype(bf16),                # [EMB, H1]
        w1c=w1[EMB_DIM:EMB_DIM + CLABEL_DIM].astype(bf16),   # [CLABEL, H1]
        w1g=w1[EMB_DIM + CLABEL_DIM:].astype(bf16),   # [GSS, H1]
        b1=params["b1"].astype(f32),
        w2=params["w2"].astype(bf16),
        b2=params["b2"].astype(f32),
        w3=params["w3"].astype(bf16),
        b3=params["b3"].astype(f32),
    )


def _dimension_semantics(grid_size):
    # v7x has 2 TensorCores/chip: CORE_PARALLEL shards clause tiles across both.
    # Single-TC chips (v5e/v6e) use plain PARALLEL (core semantics are a no-op there).
    try:
        kind = jax.devices()[0].device_kind.lower()
    except Exception:
        kind = ""
    if grid_size >= 2 and ("v7" in kind or "tpu7" in kind):
        return (pltpu.CORE_PARALLEL,)
    return (pltpu.PARALLEL,)


def clause_prediction_forward(clause_feats, gss, prepped, *, tile_n=4096):
    """Fused encoder-proj + MLP kernel over a clause-axis grid. Returns [N, C] f32."""
    n = clause_feats.shape[0]
    if n == 0:
        return jnp.zeros((0, NUM_CATEGORIES), jnp.float32)

    # 8-row (sublane) aligned tile; ragged last tile handled by Pallas boundary
    # masking (rows are independent, so padded-read garbage never leaks).
    tn = min(_round_up(tile_n, 8), _round_up(n, 8))
    grid = (pl.cdiv(n, tn),)

    clause_feats = clause_feats.astype(jnp.float32)
    gss = gss.astype(jnp.float32)

    weights = (
        prepped["we"], prepped["be"],
        prepped["w1e"], prepped["w1c"], prepped["w1g"], prepped["b1"],
        prepped["w2"], prepped["b2"],
        prepped["w3"], prepped["b3"],
    )

    def pinned(w):
        # Full-array block, constant block index -> fetched once, VMEM-resident.
        return pl.BlockSpec(w.shape, lambda i: (0, 0))

    weight_bytes = sum(int(w.size) * w.dtype.itemsize for w in weights)
    flops = 2 * n * (
        CLABEL_DIM * EMB_DIM + EMB_DIM * H1 + CLABEL_DIM * H1 + GSS_DIM * H1
        + H1 * H2 + H2 * NUM_CATEGORIES
    )
    bytes_accessed = (
        n * (CLABEL_DIM + GSS_DIM) * 4      # f32 activation inputs
        + n * NUM_CATEGORIES * 4            # real (narrow) f32 output
        + weight_bytes
    )

    return pl.pallas_call(
        _clause_prediction_kernel,
        out_shape=jax.ShapeDtypeStruct((n, NUM_CATEGORIES), jnp.float32),
        grid=grid,
        in_specs=[
            pl.BlockSpec((tn, CLABEL_DIM), lambda i: (i, 0)),
            pl.BlockSpec((tn, GSS_DIM), lambda i: (i, 0)),
        ] + [pinned(w) for w in weights],
        out_specs=pl.BlockSpec((tn, NUM_CATEGORIES), lambda i: (i, 0)),
        compiler_params=pltpu.CompilerParams(
            dimension_semantics=_dimension_semantics(grid[0])),
        cost_estimate=pl.CostEstimate(
            flops=flops, transcendentals=0, bytes_accessed=bytes_accessed),
    )(clause_feats, gss, *weights)


# --------------------------- params & reference -------------------------------
def make_params(key):
    """Deterministic synthetic parameter init (matches module __init__ shapes)."""
    ks = jax.random.split(key, 8)

    def lin(k, fan_in, fan_out):
        scale = 1.0 / jnp.sqrt(jnp.float32(fan_in))
        w = jax.random.uniform(k, (fan_in, fan_out), jnp.float32, -scale, scale)
        b = jnp.zeros((1, fan_out), jnp.float32)
        return w, b

    we, be = lin(ks[0], CLABEL_DIM, EMB_DIM)
    w1, b1 = lin(ks[1], INP_SIZE, H1)
    w2, b2 = lin(ks[2], H1, H2)
    w3, b3 = lin(ks[3], H2, NUM_CATEGORIES)
    return dict(we=we, be=be, w1=w1, b1=b1, w2=w2, b2=b2, w3=w3, b3=b3)


def reference_forward(clause_feats, gss, params):
    cembs = jnp.maximum(clause_feats @ params["we"] + params["be"], 0.0)
    x = jnp.concatenate([cembs, clause_feats, gss], axis=1)
    h1 = jnp.maximum(x @ params["w1"] + params["b1"], 0.0)
    h2 = jnp.maximum(h1 @ params["w2"] + params["b2"], 0.0)
    return h2 @ params["w3"] + params["b3"]


# ---------------------------------- main ---------------------------------------
if __name__ == "__main__":
    key = jax.random.PRNGKey(0)
    k_feat, k_gss, k_param, k_mask = jax.random.split(key, 4)

    clause_feats = jax.random.normal(k_feat, (NUM_CLAUSES, CLABEL_DIM), jnp.float32)
    gss = jax.random.normal(k_gss, (NUM_CLAUSES, GSS_DIM), jnp.float32)
    params = make_params(k_param)
    prepped = prepare_params(params)   # one-time host-side weight transform (bf16)

    # predicted_clauses mask on clause nodes (prediction=True path)
    predicted_clauses = jax.random.bernoulli(k_mask, 0.5, (NUM_CLAUSES,))

    logits = clause_prediction_forward(clause_feats, gss, prepped)
    logits = jax.block_until_ready(logits)

    # prediction-path gather: logits[pred_idx]  (glue, concrete arrays)
    pred_idx = jnp.where(predicted_clauses)[0]
    pred_logits = jax.block_until_ready(logits[pred_idx])

    # correctness check against pure-JAX f32 reference (bf16 MXU path -> loose tol)
    ref = reference_forward(clause_feats, gss, params)
    assert logits.shape == (NUM_CLAUSES, NUM_CATEGORIES)
    assert jnp.allclose(logits, ref, atol=5e-2, rtol=5e-2), "mismatch vs reference"
    assert pred_logits.shape == (int(predicted_clauses.sum()), NUM_CATEGORIES)

    print("KERNEL_OK")
</pallas_src>

<mosaic_0001>
module attributes {stable_mosaic.version = 11 : i64} {
  func.func @_clause_prediction_kernel(%arg0: i32, %arg1: memref<8x4xf32, #tpu.memory_space<vmem>>, %arg2: memref<8x8xf32, #tpu.memory_space<vmem>>, %arg3: memref<4x16xbf16, #tpu.memory_space<vmem>>, %arg4: memref<1x16xf32, #tpu.memory_space<vmem>>, %arg5: memref<16x256xbf16, #tpu.memory_space<vmem>>, %arg6: memref<4x256xbf16, #tpu.memory_space<vmem>>, %arg7: memref<8x256xbf16, #tpu.memory_space<vmem>>, %arg8: memref<1x256xf32, #tpu.memory_space<vmem>>, %arg9: memref<256x64xbf16, #tpu.memory_space<vmem>>, %arg10: memref<1x64xf32, #tpu.memory_space<vmem>>, %arg11: memref<64x2xbf16, #tpu.memory_space<vmem>>, %arg12: memref<1x2xf32, #tpu.memory_space<vmem>>, %arg13: memref<8x2xf32, #tpu.memory_space<vmem>>) attributes {dimension_semantics = [#tpu.dimension_semantics<parallel>], iteration_bounds = array<i64: 1>, scalar_prefetch = 0 : i64, scratch_operands = 0 : i64, tpu.core_type = #tpu.core_type<tc>, window_params = [{transform_indices = @transform_0, window_bounds = array<i64: 8, 4>}, {transform_indices = @transform_1, window_bounds = array<i64: 8, 8>}, {pipeline_mode = #tpu.pipeline_mode<synchronous>, transform_indices = @transform_2, window_bounds = array<i64: 4, 16>}, {pipeline_mode = #tpu.pipeline_mode<synchronous>, transform_indices = @transform_3, window_bounds = array<i64: 1, 16>}, {pipeline_mode = #tpu.pipeline_mode<synchronous>, transform_indices = @transform_4, window_bounds = array<i64: 16, 256>}, {pipeline_mode = #tpu.pipeline_mode<synchronous>, transform_indices = @transform_5, window_bounds = array<i64: 4, 256>}, {pipeline_mode = #tpu.pipeline_mode<synchronous>, transform_indices = @transform_6, window_bounds = array<i64: 8, 256>}, {pipeline_mode = #tpu.pipeline_mode<synchronous>, transform_indices = @transform_7, window_bounds = array<i64: 1, 256>}, {pipeline_mode = #tpu.pipeline_mode<synchronous>, transform_indices = @transform_8, window_bounds = array<i64: 256, 64>}, {pipeline_mode = #tpu.pipeline_mode<synchronous>, transform_indices = @transform_9, window_bounds = array<i64: 1, 64>}, {pipeline_mode = #tpu.pipeline_mode<synchronous>, transform_indices = @transform_10, window_bounds = array<i64: 64, 2>}, {pipeline_mode = #tpu.pipeline_mode<synchronous>, transform_indices = @transform_11, window_bounds = array<i64: 1, 2>}, {transform_indices = @transform_12, window_bounds = array<i64: 8, 2>}]} {
    %c0 = arith.constant 0 : index
    %c0_0 = arith.constant 0 : index
    %0 = vector.load %arg1[%c0, %c0_0] : memref<8x4xf32, #tpu.memory_space<vmem>>, vector<8x4xf32>
    %1 = arith.truncf %0 : vector<8x4xf32> to vector<8x4xbf16>
    %c0_1 = arith.constant 0 : index
    %c0_2 = arith.constant 0 : index
    %2 = vector.load %arg2[%c0_1, %c0_2] : memref<8x8xf32, #tpu.memory_space<vmem>>, vector<8x8xf32>
    %3 = arith.truncf %2 : vector<8x8xf32> to vector<8x8xbf16>
    %c0_3 = arith.constant 0 : index
    %c0_4 = arith.constant 0 : index
    %4 = vector.load %arg3[%c0_3, %c0_4] : memref<4x16xbf16, #tpu.memory_space<vmem>>, vector<4x16xbf16>
    %cst = arith.constant dense<0.000000e+00> : vector<8x16xf32>
    %5 = tpu.matmul %1, %4, %cst {dimension_numbers = #tpu.dot_dimension_numbers<[1], [0], [0], [1], [0, 0, 1, 1], [], []>} : vector<8x4xbf16>, vector<4x16xbf16>, vector<8x16xf32> -> vector<8x16xf32>
    %c0_5 = arith.constant 0 : index
    %c0_6 = arith.constant 0 : index
    %6 = vector.load %arg4[%c0_5, %c0_6] : memref<1x16xf32, #tpu.memory_space<vmem>>, vector<1x16xf32>
    %7 = vector.broadcast %6 : vector<1x16xf32> to vector<8x16xf32>
    %8 = arith.addf %5, %7 : vector<8x16xf32>
    %cst_7 = arith.constant 0.000000e+00 : f32
    %9 = vector.broadcast %cst_7 : f32 to vector<8x16xf32>
    %10 = arith.maximumf %8, %9 : vector<8x16xf32>
    %11 = arith.truncf %10 : vector<8x16xf32> to vector<8x16xbf16>
    %c0_8 = arith.constant 0 : index
    %c0_9 = arith.constant 0 : index
    %12 = vector.load %arg5[%c0_8, %c0_9] : memref<16x256xbf16, #tpu.memory_space<vmem>>, vector<16x256xbf16>
    %cst_10 = arith.constant dense<0.000000e+00> : vector<8x256xf32>
    %13 = tpu.matmul %11, %12, %cst_10 {dimension_numbers = #tpu.dot_dimension_numbers<[1], [0], [0], [1], [0, 0, 1, 1], [], []>} : vector<8x16xbf16>, vector<16x256xbf16>, vector<8x256xf32> -> vector<8x256xf32>
    %c0_11 = arith.constant 0 : index
    %c0_12 = arith.constant 0 : index
    %14 = vector.load %arg6[%c0_11, %c0_12] : memref<4x256xbf16, #tpu.memory_space<vmem>>, vector<4x256xbf16>
    %cst_13 = arith.constant dense<0.000000e+00> : vector<8x256xf32>
    %15 = tpu.matmul %1, %14, %cst_13 {dimension_numbers = #tpu.dot_dimension_numbers<[1], [0], [0], [1], [0, 0, 1, 1], [], []>} : vector<8x4xbf16>, vector<4x256xbf16>, vector<8x256xf32> -> vector<8x256xf32>
    %16 = arith.addf %13, %15 : vector<8x256xf32>
    %c0_14 = arith.constant 0 : index
    %c0_15 = arith.constant 0 : index
    %17 = vector.load %arg7[%c0_14, %c0_15] : memref<8x256xbf16, #tpu.memory_space<vmem>>, vector<8x256xbf16>
    %cst_16 = arith.constant dense<0.000000e+00> : vector<8x256xf32>
    %18 = tpu.matmul %3, %17, %cst_16 {dimension_numbers = #tpu.dot_dimension_numbers<[1], [0], [0], [1], [0, 0, 1, 1], [], []>} : vector<8x8xbf16>, vector<8x256xbf16>, vector<8x256xf32> -> vector<8x256xf32>
    %19 = arith.addf %16, %18 : vector<8x256xf32>
    %c0_17 = arith.constant 0 : index
    %c0_18 = arith.constant 0 : index
    %20 = vector.load %arg8[%c0_17, %c0_18] : memref<1x256xf32, #tpu.memory_space<vmem>>, vector<1x256xf32>
    %21 = vector.broadcast %20 : vector<1x256xf32> to vector<8x256xf32>
    %22 = arith.addf %19, %21 : vector<8x256xf32>
    %cst_19 = arith.constant 0.000000e+00 : f32
    %23 = vector.broadcast %cst_19 : f32 to vector<8x256xf32>
    %24 = arith.maximumf %22, %23 : vector<8x256xf32>
    %25 = arith.truncf %24 : vector<8x256xf32> to vector<8x256xbf16>
    %c0_20 = arith.constant 0 : index
    %c0_21 = arith.constant 0 : index
    %26 = vector.load %arg9[%c0_20, %c0_21] : memref<256x64xbf16, #tpu.memory_space<vmem>>, vector<256x64xbf16>
    %cst_22 = arith.constant dense<0.000000e+00> : vector<8x64xf32>
    %27 = tpu.matmul %25, %26, %cst_22 {dimension_numbers = #tpu.dot_dimension_numbers<[1], [0], [0], [1], [0, 0, 1, 1], [], []>} : vector<8x256xbf16>, vector<256x64xbf16>, vector<8x64xf32> -> vector<8x64xf32>
    %c0_23 = arith.constant 0 : index
    %c0_24 = arith.constant 0 : index
    %28 = vector.load %arg10[%c0_23, %c0_24] : memref<1x64xf32, #tpu.memory_space<vmem>>, vector<1x64xf32>
    %29 = vector.broadcast %28 : vector<1x64xf32> to vector<8x64xf32>
    %30 = arith.addf %27, %29 : vector<8x64xf32>
    %cst_25 = arith.constant 0.000000e+00 : f32
    %31 = vector.broadcast %cst_25 : f32 to vector<8x64xf32>
    %32 = arith.maximumf %30, %31 : vector<8x64xf32>
    %33 = arith.truncf %32 : vector<8x64xf32> to vector<8x64xbf16>
    %c0_26 = arith.constant 0 : index
    %c0_27 = arith.constant 0 : index
    %34 = vector.load %arg11[%c0_26, %c0_27] : memref<64x2xbf16, #tpu.memory_space<vmem>>, vector<64x2xbf16>
    %cst_28 = arith.constant dense<0.000000e+00> : vector<8x2xf32>
    %35 = tpu.matmul %33, %34, %cst_28 {dimension_numbers = #tpu.dot_dimension_numbers<[1], [0], [0], [1], [0, 0, 1, 1], [], []>} : vector<8x64xbf16>, vector<64x2xbf16>, vector<8x2xf32> -> vector<8x2xf32>
    %c0_29 = arith.constant 0 : index
    %c0_30 = arith.constant 0 : index
    %36 = vector.load %arg12[%c0_29, %c0_30] : memref<1x2xf32, #tpu.memory_space<vmem>>, vector<1x2xf32>
    %37 = vector.broadcast %36 : vector<1x2xf32> to vector<8x2xf32>
    %38 = arith.addf %35, %37 : vector<8x2xf32>
    %c0_31 = arith.constant 0 : index
    %c0_32 = arith.constant 0 : index
    %39 = vector.load %arg13[%c0_31, %c0_32] : memref<8x2xf32, #tpu.memory_space<vmem>>, vector<8x2xf32>
    tpu.vector_store %arg13[%c0_31, %c0_32], %38 {strides = array<i32>} : memref<8x2xf32, #tpu.memory_space<vmem>>, vector<8x2xf32>,
    return
  }
  func.func @transform_0(%arg0: i32) -> (i32, i32) {
    %c0_i32 = arith.constant 0 : i32
    %c0_i32_0 = arith.constant 0 : i32
    return %arg0, %c0_i32 : i32, i32
  }
  func.func @transform_1(%arg0: i32) -> (i32, i32) {
    %c0_i32 = arith.constant 0 : i32
    %c0_i32_0 = arith.constant 0 : i32
    return %arg0, %c0_i32 : i32, i32
  }
  func.func @transform_2(%arg0: i32) -> (i32, i32) {
    %c0_i32 = arith.constant 0 : i32
    %c0_i32_0 = arith.constant 0 : i32
    %c0_i32_1 = arith.constant 0 : i32
    return %c0_i32, %c0_i32_0 : i32, i32
  }
  func.func @transform_3(%arg0: i32) -> (i32, i32) {
    %c0_i32 = arith.constant 0 : i32
    %c0_i32_0 = arith.constant 0 : i32
    %c0_i32_1 = arith.constant 0 : i32
    return %c0_i32, %c0_i32_0 : i32, i32
  }
  func.func @transform_4(%arg0: i32) -> (i32, i32) {
    %c0_i32 = arith.constant 0 : i32
    %c0_i32_0 = arith.constant 0 : i32
    %c0_i32_1 = arith.constant 0 : i32
    return %c0_i32, %c0_i32_0 : i32, i32
  }
  func.func @transform_5(%arg0: i32) -> (i32, i32) {
    %c0_i32 = arith.constant 0 : i32
    %c0_i32_0 = arith.constant 0 : i32
    %c0_i32_1 = arith.constant 0 : i32
    return %c0_i32, %c0_i32_0 : i32, i32
  }
  func.func @transform_6(%arg0: i32) -> (i32, i32) {
    %c0_i32 = arith.constant 0 : i32
    %c0_i32_0 = arith.constant 0 : i32
    %c0_i32_1 = arith.constant 0 : i32
    return %c0_i32, %c0_i32_0 : i32, i32
  }
  func.func @transform_7(%arg0: i32) -> (i32, i32) {
    %c0_i32 = arith.constant 0 : i32
    %c0_i32_0 = arith.constant 0 : i32
    %c0_i32_1 = arith.constant 0 : i32
    return %c0_i32, %c0_i32_0 : i32, i32
  }
  func.func @transform_8(%arg0: i32) -> (i32, i32) {
    %c0_i32 = arith.constant 0 : i32
    %c0_i32_0 = arith.constant 0 : i32
    %c0_i32_1 = arith.constant 0 : i32
    return %c0_i32, %c0_i32_0 : i32, i32
  }
  func.func @transform_9(%arg0: i32) -> (i32, i32) {
    %c0_i32 = arith.constant 0 : i32
    %c0_i32_0 = arith.constant 0 : i32
    %c0_i32_1 = arith.constant 0 : i32
    return %c0_i32, %c0_i32_0 : i32, i32
  }
  func.func @transform_10(%arg0: i32) -> (i32, i32) {
    %c0_i32 = arith.constant 0 : i32
    %c0_i32_0 = arith.constant 0 : i32
    %c0_i32_1 = arith.constant 0 : i32
    return %c0_i32, %c0_i32_0 : i32, i32
  }
  func.func @transform_11(%arg0: i32) -> (i32, i32) {
    %c0_i32 = arith.constant 0 : i32
    %c0_i32_0 = arith.constant 0 : i32
    %c0_i32_1 = arith.constant 0 : i32
    return %c0_i32, %c0_i32_0 : i32, i32
  }
  func.func @transform_12(%arg0: i32) -> (i32, i32) {
    %c0_i32 = arith.constant 0 : i32
    %c0_i32_0 = arith.constant 0 : i32
    return %arg0, %c0_i32 : i32, i32
  }
}

</mosaic_0001>

<bundles_post_ra>
// kernel: tpu_custom_call.1
= control target key start
LH: loop header
LB: loop body
LE: loop exit
PB: predicated region body
PF: predicated region fallthrough
CT: control target
= control target key end

     0   :  { %vm58_vm0 = vcmask 1041408   ;;  %v672_v0 = vmov 0.0   ;;  %vm673_vm1 = vmmov 0   ;;  %v674_v6 = vmov 0   ;;  %s848_s2 = inlined_call_operand.vmem [shape: bf16[4,16], index: 2, kind: input, shape index: {}]   ;;  %s849_s0 = inlined_call_operand.vmem [shape: f32[8,4], index: 0, kind: input, shape index: {}]   ;;  %s850_s5 = inlined_call_operand.vmem [shape: bf16[4,256], index: 5, kind: input, shape index: {}]   ;;  %s851_s6 = inlined_call_operand.vmem [shape: bf16[8,256], index: 6, kind: input, shape index: {}]   ;;  %s852_s4 = inlined_call_operand.vmem [shape: bf16[16,256], index: 4, kind: input, shape index: {}]   ;;  %s853_s1 = inlined_call_operand.vmem [shape: f32[8,8], index: 1, kind: input, shape index: {}]   ;;  %s854_s8 = inlined_call_operand.vmem [shape: bf16[256,64], index: 8, kind: input, shape index: {}]   ;;  %s855_s3 = inlined_call_operand.vmem [shape: f32[1,16], index: 3, kind: input, shape index: {}]   ;;  %s856_s10 = inlined_call_operand.vmem [shape: bf16[64,2], index: 10, kind: input, shape index: {}]   ;;  %s857_s7 = inlined_call_operand.vmem [shape: f32[1,256], index: 7, kind: input, shape index: {}]   ;;  %s858_s9 = inlined_call_operand.vmem [shape: f32[1,64], index: 9, kind: input, shape index: {}]   ;;  %s859_s11 = inlined_call_operand.vmem [shape: f32[1,2], index: 11, kind: input, shape index: {}]   ;;  %s860_s12 = inlined_call_operand.vmem [shape: f32[8,2], index: 12, kind: output, shape index: {}]  }
   0x1   :  { %626 = vmatprep.subr.bf16.mxu1 %v672_v0  ;;  %v46_v1 = vld [vmem:[%s848_s2] sm:$0x3]  ;;  %628 = vmatprep.mubr.msk.bf16.mxu1 %vm673_vm1, %v672_v0  ;;  %vm54_vm2 = vcmask 31744   ;;  %vm228_vm3 = vcmask 1043456   ;;  %v649_v12 = vld [vmem:[%s852_s4 + $0x4] ss:$8 sps:$4 sm:$0xff]   ;;  %v280_v51 = vlaneseq }
   0x2   :  { %v42_v2 = vld [vmem:[%s849_s0] sm:$0xff]  ;;  %v60_v3 = vsel %vm58_vm0, %v46_v1, 0  ;;  %209 = vmatprep.mubr.bf16.mxu0 %v674_v6  ;;  %177 = vmatprep.subr.bf16.mxu0 %v649_v12  ;;  %vm224_vm4 = vcmask 64512   ;;  %vm173_vm5 = vcmask 130048   ;;  %v654_v27 = vld [vmem:[%s854_s8 + $0x48] sm:$0xff]   ;;  %v656_v30 = vld [vmem:[%s854_s8 + $0x50] sm:$0xff]  }
   0x3   :  { %v43_v4 = vpack.c.bf16 %v42_v2, %v42_v2  ;;  %v564_v5 = vld.sshfl [vmem:[%s850_s5] sm:$0x33 pattern:$0x76325410]  ;;  %627 = vmatpush3.bf16.msra.mxu1 %v60_v3  ;;  %v655_v28 = vld [vmem:[%s854_s8 + $0x8] sm:$0xff]   ;;  %v657_v34 = vld [vmem:[%s854_s8 + $0x10] sm:$0xff]  }
   0x4   :  { %v115_v7 = vcombine.high %v564_v5, %v564_v5  ;;  %v117_v8 = vsel %vm58_vm0, %v564_v5, 0  ;;  %v218_v9 = vld [vmem:[%s851_s6] sm:$0xff]  ;;  %v658_v35 = vld [vmem:[%s854_s8 + $0x58] sm:$0xff]   ;;  %v662_v40 = vld [vmem:[%s854_s8 + $0x68] sm:$0xff]   ;;  %v281_v52 = vshrl.u32 %v280_v51, 7  ;;  %vm512_vm6 = vcmask 523264  }
   0x5   :  { %v571_v10 = vcombine.high %v218_v9, %v218_v9  ;;  %v570_v11 = vcombine.low %v218_v9, %v218_v9  ;;  %v651_v14 = vld [vmem:[%s852_s4] ss:$8 sps:$4 sm:$0xff]   ;;  %v659_v36 = vld [vmem:[%s854_s8 + $0x18] sm:$0xff]   ;;  %v664_v45 = vld [vmem:[%s854_s8 + $0x70] sm:$0xff]   ;;  %vm556_vm7 = vcmask 15360  }
   0x6   :  { %565 = vmatprep.subr.msk.bf16.mxu1 %vm58_vm0, %v115_v7  ;;  %629 = vmatmul.mubr.msk.bf16.vlgmr.msra.gmra.mrb[0].mxu1 %vm54_vm2, %v43_v4  ;;  %v44_v15 = vld [vmem:[%s853_s1] sm:$0xff]  ;;  %v663_v42 = vld [vmem:[%s854_s8 + $0x28] sm:$0xff]   ;;  %v665_v46 = vld [vmem:[%s854_s8 + $0x30] sm:$0xff]   ;;  %v282_v53 = vsub.s32 0, %v281_v52  ;;  %v286_v55 = vsub.s32 1, %v281_v52 }
   0x7   :  { %123 = vmatpush1.bf16.msra.mxu1 %v117_v8  ;;  %154 = vmatprep.mubr.bf16.mxu1 %v674_v6  ;;  %v230_v13 = vsel %vm228_vm3, %v570_v11, 0  ;;  %v45_v16 = vpack.c.bf16 %v44_v15, %v44_v15  ;;  %v652_v17 = vld [vmem:[%s854_s8 + $0x40] sm:$0xff]   ;;  %v666_v47 = vld [vmem:[%s854_s8 + $0x78] sm:$0xff]   ;;  %v669_v50 = vld [vmem:[%s856_s10 + $0x8] sm:$0xff]  }
   0x8   :  { %572 = vmatprep.subr.msk.bf16.mxu1 %vm228_vm3, %v571_v10  ;;  %178 = vmatpush1.bf16.msra.mxu0 %v651_v14  ;;  %v562_v18 = vld [vmem:[%s855_s3] ss:$0 sm:$0xff]  ;;  %v667_v48 = vld [vmem:[%s854_s8 + $0x38] sm:$0xff]   ;;  %v670_v9 = vld [vmem:[%s856_s10 + $0x10] sm:$0xff]  }
   0x9   :  { %599 = vmatprep.subr.bf16.mxu0 %v652_v17  ;;  %v653_v25 = vld [vmem:[%s854_s8] sm:$0xff]   ;;  %v671_v10 = vld [vmem:[%s856_s10 + $0x18] sm:$0xff]  }
   0xa   :  { %v660_v37 = vld [vmem:[%s854_s8 + $0x60] sm:$0xff]  }
   0xb   :  { %v661_v38 = vld [vmem:[%s854_s8 + $0x20] sm:$0xff]  }
   0xc   :  { %v668_v49 = vld [vmem:[%s856_s10] sm:$0xff]  }
   0xd   :  { %v278_v54 = vld [vmem:[%s857_s7] sm:$0x3] }
   0xe   :  { %566 = vmatmul.mubr.msk.bf16.vlgmr.msra.gmra.mrb[4].mxu1 %vm54_vm2, %v43_v4  ;;  %v283_v58 = vrot.slane %v278_v54, %v282_v53  ;;  %v287_v61 = vrot.slane %v278_v54, %v286_v55  ;;  %v574_v12 = vld [vmem:[%s858_s9] ss:$0 sm:$0xff] }
   0xf   :  { %267 = vmatprep.mubr.bf16.mxu1 %v674_v6  ;;  %236 = vmatpush1.bf16.msra.mxu1 %v230_v13 }
  0x10   :  { %632 = vmatprep.subr.bf16.mxu1 %v672_v0 }
  0x16   :  { %573 = vmatmul.mubr.msk.bf16.vlgmr.msra.gmra.mrb[8].mxu1 %vm224_vm4, %v45_v16 }
  0x17   :  { %640 = vmatprep.mubr.msk.bf16.mxu1 %vm673_vm1, %v672_v0  ;;  %633 = vmatpush3.bf16.msra.mxu1 %v668_v49 }
  0x18   :  { %634 = vmatprep.subr.bf16.mxu1 %v672_v0 }
  0x1b   :  { %635 = vmatpush3.bf16.msra.mxu1 %v669_v50 }
  0x1c   :  { %636 = vmatprep.subr.bf16.mxu1 %v672_v0 }
  0x1f   :  { %637 = vmatpush3.bf16.msra.mxu1 %v670_v9 }
  0x20   :  { %638 = vmatprep.subr.bf16.mxu1 %v672_v0  ;;  %v591_v0 = vld [vmem:[%s859_s11] ss:$0 sm:$0xff] }
  0x23   :  { %639 = vmatpush3.bf16.msra.mxu1 %v671_v10 }
  0xd9   :  { %v96_v19 = vpop.f32.mrb[0].mxu1 }
  0xda   :  { %v97_v20 = vadd.f32 %v562_v18, %v96_v19  ;;  %v630_v21 = vpop.f32.mrb[1].mxu1 }
  0xdb   :  { %v99_v22 = vpop.f32.mrb[2].mxu1 }
  0xdc   :  { %v102_v23 = vmax.f32 %v97_v20, 0.0  ;;  %v631_v24 = vpop.f32.mrb[3].mxu1 }
  0xde   :  { %v103_v26 = vpack.c.bf16 %v102_v23, %v102_v23 }
  0xe0   :  { %569 = vmatmul.mubr.msk.bf16.vlgmr.msra.gmra.mrb[0].mxu0 %vm173_vm5, %v103_v26 }
  0xe1   :  { %600 = vmatpush3.bf16.msra.mxu0 %v653_v25  ;;  %v156_v29 = vpop.f32.mrb[4].mxu1 }
  0xe2   :  { %601 = vmatprep.subr.bf16.mxu0 %v654_v27  ;;  %v158_v31 = vpop.f32.mrb[5].mxu1 }
  0xe3   :  { %v160_v32 = vpop.f32.mrb[6].mxu1 }
  0xe4   :  { %v161_v33 = vpop.f32.mrb[7].mxu1 }
  0xe5   :  { %602 = vmatpush3.bf16.msra.mxu0 %v655_v28 }
  0xe6   :  { %603 = vmatprep.subr.bf16.mxu0 %v656_v30 }
  0xe9   :  { %604 = vmatpush3.bf16.msra.mxu0 %v657_v34  ;;  %v269_v39 = vpop.f32.mrb[8].mxu1 }
  0xea   :  { %605 = vmatprep.subr.bf16.mxu0 %v658_v35  ;;  %v271_v41 = vpop.f32.mrb[9].mxu1 }
  0xeb   :  { %v273_v43 = vpop.f32.mrb[10].mxu1 }
  0xec   :  { %v274_v44 = vpop.f32.mrb[11].mxu1 }
  0xed   :  { %606 = vmatpush3.bf16.msra.mxu0 %v659_v36 }
  0xee   :  { %607 = vmatprep.subr.bf16.mxu0 %v660_v37 }
  0xf1   :  { %608 = vmatpush3.bf16.msra.mxu0 %v661_v38 }
  0xf2   :  { %609 = vmatprep.subr.bf16.mxu0 %v662_v40 }
  0xf5   :  { %610 = vmatpush3.bf16.msra.mxu0 %v663_v42 }
  0xf6   :  { %611 = vmatprep.subr.bf16.mxu0 %v664_v45 }
  0xf9   :  { %612 = vmatpush3.bf16.msra.mxu0 %v665_v46 }
  0xfa   :  { %613 = vmatprep.subr.bf16.mxu0 %v666_v47 }
  0xfd   :  { %614 = vmatpush3.bf16.msra.mxu0 %v667_v48 }
 0x1b3   :  { %v211_v56 = vpop.f32.mrb[0].mxu0 }
 0x1b4   :  { %v212_v57 = vadd.f32 %v211_v56, %v156_v29  ;;  %v213_v59 = vpop.f32.mrb[1].mxu0 }
 0x1b5   :  { %v214_v60 = vadd.f32 %v213_v59, %v158_v31  ;;  %v215_v62 = vpop.f32.mrb[2].mxu0 }
 0x1b6   :  { %v276_v63 = vadd.f32 %v269_v39, %v212_v57  ;;  %v216_v1 = vpop.f32.mrb[3].mxu0 }
 0x1b7   :  { %v277_v2 = vadd.f32 %v271_v41, %v214_v60 }
 0x1b8   :  { %v290_v3 = vadd.f32 %v283_v58, %v276_v63 }
 0x1b9   :  { %v291_v4 = vadd.f32 %v287_v61, %v277_v2 }
 0x1ba   :  { %v292_v5 = vmax.f32 %v290_v3, 0.0 }
 0x1bb   :  { %v293_v6 = vmax.f32 %v291_v4, 0.0 }
 0x1bc   :  { %v294_v8 = vpack.c.bf16 %v292_v5, %v292_v5 }
 0x1bd   :  { %v295_v7 = vpack.c.bf16 %v293_v6, %v293_v6 }
 0x1bf   :  { %463 = vmatprep.mubr.bf16.mxu0 %v295_v7 }
 0x1c0   :  { %464 = vmatmul.mubr.bf16.vlgmr.msra.gmra.mrb[4].mxu0 %v294_v8 }
 0x293   :  { %v615_v11 = vpop.f32.mrb[4].mxu0 }
 0x294   :  { %v616_v13 = vpop.f32.mrb[5].mxu0 }
 0x295   :  { %v617_v14 = vadd.f32 %v616_v13, %v615_v11  ;;  %v618_v15 = vpop.f32.mrb[6].mxu0 }
 0x296   :  { %v619_v16 = vpop.f32.mrb[7].mxu0 }
 0x297   :  { %v466_v17 = vadd.f32 %v617_v14, %v574_v12 }
 0x299   :  { %v471_v18 = vmax.f32 %v466_v17, 0.0 }
 0x29b   :  { %v472_v19 = vpack.c.bf16 %v471_v18, %v471_v18 }
 0x29d   :  { %641 = vmatmul.mubr.msk.bf16.vlgmr.msra.gmra.mrb[12].mxu1 %vm512_vm6, %v472_v19 }
 0x370   :  { %v550_v20 = vpop.f32.mrb[12].mxu1 }
 0x371   :  { %v551_v21 = vadd.f32 %v591_v0, %v550_v20  ;;  %v642_v22 = vpop.f32.mrb[13].mxu1 }
 0x372   :  { %v553_v23 = vpop.f32.mrb[14].mxu1 }
 0x373   :  { %557 = vst.msk [vmem:[%s860_s12] sm:$0xff] %vm556_vm7, %v551_v21  ;;  %v643_v24 = vpop.f32.mrb[15].mxu1 }

</bundles_post_ra>
